<compile_context>
chip_gen: v7x
topology: tpu7x:2x2x1
jax: 0.10.0
libtpu: 0.0.40
codegen_flags: <defaults>
</compile_context>

<pallas_src>
import functools

import jax
import jax.numpy as jnp
from jax.experimental import pallas as pl
from jax.experimental.pallas import tpu as pltpu


def _channel_se_kernel(x_ref, w1_ref, w2_ref, o_ref, *, nb, c, inv_hw):
    # x_ref block: (nb*C, HWp), rows = packed (sample, channel) pairs.
    w1 = w1_ref[...]                                # (Cr, C)
    w2 = w2_ref[...]                                # (C, Cr)
    for s in range(nb):                             # static unroll (nb is capped)
        rows = pl.ds(s * c, c)
        xs = x_ref[rows, :]                                          # (C, HWp)
        # Global average pool per channel (lane reduce; padded lanes are zero).
        ys = jnp.sum(xs, axis=-1, keepdims=True) * inv_hw            # (C, 1)
        # Excitation MLP on the original weights (O(C*Cr) work, off roofline).
        hs = jnp.maximum(
            jnp.dot(w1, ys, preferred_element_type=jnp.float32), 0.0)  # (Cr, 1)
        zs = jax.nn.sigmoid(
            jnp.dot(w2, hs, preferred_element_type=jnp.float32))       # (C, 1)
        # Lane-dense gated store for this sample's rows.
        o_ref[rows, :] = (xs * zs).astype(o_ref.dtype)


def _vmem_budget():
    """Per-generation block budget and scoped-VMEM limit."""
    try:
        phys = int(pltpu.get_tpu_info().vmem_capacity_bytes)   # 128 MiB v5e/v6e, 64 MiB v7x
    except Exception:
        phys = 64 << 20                                        # conservative fallback
    limit = min(phys * 3 // 4, 96 << 20)     # requested scoped VMEM limit
    block = max(2 << 20, limit // 5)         # in+out double-buffered ~= 4x block
    return block, limit


def _pick_nb(n, c, hwp, block_budget_bytes, unroll_cap=64):
    """Samples per grid block.

    Legal: nb | N and (nb*C % 8 == 0 or nb == N)  -> (8,128) BlockSpec rule.
    Pick the largest legal nb that fits the VMEM block budget and the unroll
    cap, preferring grid = N//nb >= 2 (keeps both v7x TensorCores busy).
    """
    bytes_per_sample = c * hwp * 4
    cands = [nb for nb in range(1, n + 1)
             if n % nb == 0 and ((nb * c) % 8 == 0 or nb == n)]
    fitting = [nb for nb in cands
               if nb <= unroll_cap and nb * bytes_per_sample <= block_budget_bytes]
    if not fitting:
        # Correctness first: smallest legal block (may exceed the soft budget).
        return min(cands)
    multi = [nb for nb in fitting if n // nb >= 2]
    return max(multi) if multi else max(fitting)


@jax.jit
def channel_se_pallas(x_nchw, w1, w2):
    """x_nchw: (N, C, H, W); w1: (Cr, C) Linear(C->Cr); w2: (C, Cr) Linear(Cr->C).

    Both Linear layers are bias-free, matching the PyTorch module.
    """
    N, C, H, W = x_nchw.shape
    HW = H * W
    HWp = ((HW + 127) // 128) * 128          # lane-dense loads/stores
    Cr = w1.shape[0]

    block_budget, vmem_limit = _vmem_budget()
    nb = _pick_nb(N, C, HWp, block_budget)
    rb = nb * C
    grid = N // nb

    x2 = x_nchw.reshape(N * C, HW)
    if HWp != HW:
        x2 = jnp.pad(x2, ((0, 0), (0, HWp - HW)))   # zeros; mean uses 1/HW below

    kernel = functools.partial(_channel_se_kernel, nb=nb, c=C, inv_hw=1.0 / HW)

    out2 = pl.pallas_call(
        kernel,
        out_shape=jax.ShapeDtypeStruct((N * C, HWp), x2.dtype),
        grid_spec=pltpu.PrefetchScalarGridSpec(
            num_scalar_prefetch=0,
            grid=(grid,),
            in_specs=[
                pl.BlockSpec((rb, HWp), lambda g: (g, 0)),
                # Constant blocks (index_map == (0, 0)): fetched once and kept
                # resident; they need no double buffering and use O(C*Cr) VMEM.
                pl.BlockSpec((Cr, C), lambda g: (0, 0)),
                pl.BlockSpec((C, Cr), lambda g: (0, 0)),
            ],
            out_specs=pl.BlockSpec((rb, HWp), lambda g: (g, 0)),
        ),
        compiler_params=pltpu.CompilerParams(
            dimension_semantics=("parallel",),
            vmem_limit_bytes=vmem_limit,
        ),
    )(x2, w1, w2)

    out2 = out2[:, :HW]
    return out2.reshape(N, C, H, W)


def channel_se_reference(x, w1, w2):
    """Pure-JAX reference of ChannelSE.forward (NCHW)."""
    y = jnp.mean(x, axis=(2, 3))                 # (N, C)
    h = jnp.maximum(y @ w1.T, 0.0)               # (N, Cr)
    z = jax.nn.sigmoid(h @ w2.T)                 # (N, C)
    return x * z[:, :, None, None]


if __name__ == "__main__":
    key = jax.random.PRNGKey(0)
    N, C, H, W = 2, 4, 16, 16
    reduction = 4
    Cr = int(C / reduction)                      # = 1

    k_x, k_w1, k_w2 = jax.random.split(key, 3)
    x = jax.random.normal(k_x, (N, C, H, W), dtype=jnp.float32)
    w1 = jax.random.normal(k_w1, (Cr, C), dtype=jnp.float32) * 0.5   # Linear(C -> Cr)
    w2 = jax.random.normal(k_w2, (C, Cr), dtype=jnp.float32) * 0.5   # Linear(Cr -> C)

    out = channel_se_pallas(x, w1, w2)
    jax.block_until_ready(out)

    ref = channel_se_reference(x, w1, w2)
    assert out.shape == (N, C, H, W)
    assert jnp.allclose(out, ref, atol=1e-5, rtol=1e-5), "mismatch vs reference"

    print("KERNEL_OK")
</pallas_src>

<mosaic_0001>
module attributes {stable_mosaic.version = 11 : i64} {
  func.func @_channel_se_kernel(%arg0: i32, %arg1: memref<8x256xf32, #tpu.memory_space<vmem>>, %arg2: memref<1x4xf32, #tpu.memory_space<vmem>>, %arg3: memref<4x1xf32, #tpu.memory_space<vmem>>, %arg4: memref<8x256xf32, #tpu.memory_space<vmem>>) attributes {dimension_semantics = [#tpu.dimension_semantics<parallel>], iteration_bounds = array<i64: 1>, scalar_prefetch = 0 : i64, scratch_operands = 0 : i64, tpu.core_type = #tpu.core_type<tc>, window_params = [{transform_indices = @transform_0, window_bounds = array<i64: 8, 256>}, {pipeline_mode = #tpu.pipeline_mode<synchronous>, transform_indices = @transform_1, window_bounds = array<i64: 1, 4>}, {pipeline_mode = #tpu.pipeline_mode<synchronous>, transform_indices = @transform_2, window_bounds = array<i64: 4, 1>}, {transform_indices = @transform_3, window_bounds = array<i64: 8, 256>}]} {
    %c0 = arith.constant 0 : index
    %c0_0 = arith.constant 0 : index
    %0 = vector.load %arg2[%c0, %c0_0] : memref<1x4xf32, #tpu.memory_space<vmem>>, vector<1x4xf32>
    %c0_1 = arith.constant 0 : index
    %c0_2 = arith.constant 0 : index
    %1 = vector.load %arg3[%c0_1, %c0_2] : memref<4x1xf32, #tpu.memory_space<vmem>>, vector<4x1xf32>
    %c0_3 = arith.constant 0 : index
    %c0_4 = arith.constant 0 : index
    %2 = vector.load %arg1[%c0_3, %c0_4] : memref<8x256xf32, #tpu.memory_space<vmem>>, vector<4x256xf32>
    %cst = arith.constant dense<0.000000e+00> : vector<4xf32>
    %3 = vector.multi_reduction <add>, %2, %cst [1] : vector<4x256xf32> to vector<4xf32>
    %4 = vector.shape_cast %3 : vector<4xf32> to vector<4x1xf32>
    %cst_5 = arith.constant 3.906250e-03 : f32
    %5 = vector.broadcast %cst_5 : f32 to vector<4x1xf32>
    %6 = arith.mulf %4, %5 : vector<4x1xf32>
    %cst_6 = arith.constant dense<0.000000e+00> : vector<1x1xf32>
    %7 = tpu.matmul %0, %6, %cst_6 {dimension_numbers = #tpu.dot_dimension_numbers<[1], [0], [0], [1], [0, 0, 1, 1], [], []>} : vector<1x4xf32>, vector<4x1xf32>, vector<1x1xf32> -> vector<1x1xf32>
    %cst_7 = arith.constant 0.000000e+00 : f32
    %8 = vector.broadcast %cst_7 : f32 to vector<1x1xf32>
    %9 = arith.maximumf %7, %8 : vector<1x1xf32>
    %cst_8 = arith.constant dense<0.000000e+00> : vector<4x1xf32>
    %10 = tpu.matmul %1, %9, %cst_8 {dimension_numbers = #tpu.dot_dimension_numbers<[1], [0], [0], [1], [0, 0, 1, 1], [], []>} : vector<4x1xf32>, vector<1x1xf32>, vector<4x1xf32> -> vector<4x1xf32>
    %11 = arith.negf %10 : vector<4x1xf32>
    %12 = math.exp %11 : vector<4x1xf32>
    %cst_9 = arith.constant 1.000000e+00 : f32
    %13 = vector.broadcast %cst_9 : f32 to vector<4x1xf32>
    %14 = arith.addf %13, %12 : vector<4x1xf32>
    %15 = arith.divf %13, %14 : vector<4x1xf32>
    %16 = vector.broadcast %15 : vector<4x1xf32> to vector<4x256xf32>
    %17 = arith.mulf %2, %16 : vector<4x256xf32>
    %c0_10 = arith.constant 0 : index
    %c0_11 = arith.constant 0 : index
    %18 = vector.load %arg4[%c0_10, %c0_11] : memref<8x256xf32, #tpu.memory_space<vmem>>, vector<4x256xf32>
    tpu.vector_store %arg4[%c0_10, %c0_11], %17 {strides = array<i32>} : memref<8x256xf32, #tpu.memory_space<vmem>>, vector<4x256xf32>,
    %c4 = arith.constant 4 : index
    %c0_12 = arith.constant 0 : index
    %19 = vector.load %arg1[%c4, %c0_12] : memref<8x256xf32, #tpu.memory_space<vmem>>, vector<4x256xf32>
    %cst_13 = arith.constant dense<0.000000e+00> : vector<4xf32>
    %20 = vector.multi_reduction <add>, %19, %cst_13 [1] : vector<4x256xf32> to vector<4xf32>
    %21 = vector.shape_cast %20 : vector<4xf32> to vector<4x1xf32>
    %cst_14 = arith.constant 3.906250e-03 : f32
    %22 = vector.broadcast %cst_14 : f32 to vector<4x1xf32>
    %23 = arith.mulf %21, %22 : vector<4x1xf32>
    %cst_15 = arith.constant dense<0.000000e+00> : vector<1x1xf32>
    %24 = tpu.matmul %0, %23, %cst_15 {dimension_numbers = #tpu.dot_dimension_numbers<[1], [0], [0], [1], [0, 0, 1, 1], [], []>} : vector<1x4xf32>, vector<4x1xf32>, vector<1x1xf32> -> vector<1x1xf32>
    %cst_16 = arith.constant 0.000000e+00 : f32
    %25 = vector.broadcast %cst_16 : f32 to vector<1x1xf32>
    %26 = arith.maximumf %24, %25 : vector<1x1xf32>
    %cst_17 = arith.constant dense<0.000000e+00> : vector<4x1xf32>
    %27 = tpu.matmul %1, %26, %cst_17 {dimension_numbers = #tpu.dot_dimension_numbers<[1], [0], [0], [1], [0, 0, 1, 1], [], []>} : vector<4x1xf32>, vector<1x1xf32>, vector<4x1xf32> -> vector<4x1xf32>
    %28 = arith.negf %27 : vector<4x1xf32>
    %29 = math.exp %28 : vector<4x1xf32>
    %cst_18 = arith.constant 1.000000e+00 : f32
    %30 = vector.broadcast %cst_18 : f32 to vector<4x1xf32>
    %31 = arith.addf %30, %29 : vector<4x1xf32>
    %32 = arith.divf %30, %31 : vector<4x1xf32>
    %33 = vector.broadcast %32 : vector<4x1xf32> to vector<4x256xf32>
    %34 = arith.mulf %19, %33 : vector<4x256xf32>
    %c4_19 = arith.constant 4 : index
    %c0_20 = arith.constant 0 : index
    %35 = vector.load %arg4[%c4_19, %c0_20] : memref<8x256xf32, #tpu.memory_space<vmem>>, vector<4x256xf32>
    tpu.vector_store %arg4[%c4_19, %c0_20], %34 {strides = array<i32>} : memref<8x256xf32, #tpu.memory_space<vmem>>, vector<4x256xf32>,
    return
  }
  func.func @transform_0(%arg0: i32) -> (i32, i32) {
    %c0_i32 = arith.constant 0 : i32
    %c0_i32_0 = arith.constant 0 : i32
    return %arg0, %c0_i32 : i32, i32
  }
  func.func @transform_1(%arg0: i32) -> (i32, i32) {
    %c0_i32 = arith.constant 0 : i32
    %c0_i32_0 = arith.constant 0 : i32
    %c0_i32_1 = arith.constant 0 : i32
    return %c0_i32, %c0_i32_0 : i32, i32
  }
  func.func @transform_2(%arg0: i32) -> (i32, i32) {
    %c0_i32 = arith.constant 0 : i32
    %c0_i32_0 = arith.constant 0 : i32
    %c0_i32_1 = arith.constant 0 : i32
    return %c0_i32, %c0_i32_0 : i32, i32
  }
  func.func @transform_3(%arg0: i32) -> (i32, i32) {
    %c0_i32 = arith.constant 0 : i32
    %c0_i32_0 = arith.constant 0 : i32
    return %arg0, %c0_i32 : i32, i32
  }
}

</mosaic_0001>

<bundles_post_ra>
// kernel: channel_se_pallas.1
= control target key start
LH: loop header
LB: loop body
LE: loop exit
PB: predicated region body
PF: predicated region fallthrough
CT: control target
= control target key end

     0   :  { %vm18_vm0 = vcmask 1043456   ;;  %vm198_vm1 = vcmask 1047556   ;;  %v424_v10 = vmov 0.0   ;;  %vm425_vm2 = vmmov 0   ;;  %s501_s0 = inlined_call_operand.vmem [shape: f32[8,256], index: 0, kind: input, shape index: {}]   ;;  %s502_s1 = inlined_call_operand.vmem [shape: f32[1,4], index: 1, kind: input, shape index: {}]   ;;  %s503_s2 = inlined_call_operand.vmem [shape: f32[4,1], index: 2, kind: input, shape index: {}]   ;;  %s504_s3 = inlined_call_operand.vmem [shape: f32[8,256], index: 3, kind: output, shape index: {}]  }
   0x1   :  { %v450_v0 = vld [vmem:[%s501_s0] sm:$0xf]  ;;  %v455_v1 = vld [vmem:[%s501_s0 + $0x8] sm:$0xf]  ;;  %v460_v2 = vld [vmem:[%s501_s0] sm:$0xf0]  ;;  %391 = vmatprep.subr.mxu0 %v424_v10  ;;  %396 = vmatprep.subr.mxu1 %v424_v10 }
   0x2   :  { %v19_v3 = vsel %vm18_vm0, %v450_v0, 0.0  ;;  %v20_v4 = vsel %vm18_vm0, %v455_v1, 0.0  ;;  %v469_v5 = vld [vmem:[%s501_s0 + $0x8] sm:$0xf0]  ;;  %v199_v6 = vsel %vm198_vm1, %v460_v2, 0.0  ;;  %393 = vmatprep.mubr.msk.f32.mxu0 %vm425_vm2, %v424_v10  ;;  %398 = vmatprep.mubr.msk.f32.mxu1 %vm425_vm2, %v424_v10  ;;  %vm25_vm3 = vcmask 31744  }
   0x3   :  { %v21_v7 = vadd.f32 %v20_v4, %v19_v3  ;;  %v200_v8 = vsel %vm198_vm1, %v469_v5, 0.0  ;;  %v14_v13 = vld [vmem:[%s502_s1] sm:$0x1]  ;;  %vm107_vm4 = vcmask 1040384   ;;  %vm103_vm5 = vcmask 7168  }
   0x4   :  { %v201_v9 = vadd.f32 %v200_v8, %v199_v6  ;;  %v15_v20 = vld [vmem:[%s503_s2] sm:$0xf]  ;;  %v426_v24 = vmov 0  }
   0x5   :  { %22 = vadd.xlane.f32.xlu0 %v21_v7  ;;  %414 = vset.pattern.permute.xlu1 %v426_v24 }
   0x6   :  { %415 = vset.pattern.permute.xlu0 %v426_v24 }
   0x9   :  { %202 = vadd.xlane.f32.xlu0 %v201_v9 }
  0x92   :  { %v23_v11 = vpop.xlane.xlu0 %22 }
  0x93   :  { %v24_v12 = vmul.f32 0.00390625, %v23_v11 }
  0x95   :  { %392 = vmatpush3.msk.msra.mxu0 %vm18_vm0, %v24_v12 }
  0x96   :  { %v203_v14 = vpop.xlane.xlu0 %202  ;;  %394 = vmatmul.mubr.msk.f32.vlgmr.msra.gmra.mrb[0].mxu0 %vm25_vm3, %v14_v13  ;;  %401 = vmatprep.subr.mxu0 %v424_v10 }
  0x97   :  { %v204_v15 = vmul.f32 0.00390625, %v203_v14  ;;  %403 = vmatprep.mubr.msk.f32.mxu0 %vm425_vm2, %v424_v10 }
  0x99   :  { %v206_v16 = vrot.slane %v204_v15, 4 }
  0x9b   :  { %402 = vmatpush3.msk.msra.mxu0 %vm18_vm0, %v206_v16 }
  0x9c   :  { %404 = vmatmul.mubr.msk.f32.vlgmr.msra.gmra.mrb[2].mxu0 %vm25_vm3, %v14_v13 }
 0x169   :  { %v98_v17 = vpop.f32.mrb[0].mxu0 }
 0x16a   :  { %v102_v18 = vmax.f32 %v98_v17, 0.0  ;;  %v395_v19 = vpop.f32.mrb[1].mxu0 }
 0x16c   :  { %397 = vmatpush3.msk.msra.mxu1 %vm107_vm4, %v102_v18 }
 0x16d   :  { %399 = vmatmul.mubr.msk.f32.vlgmr.msra.gmra.mrb[0].mxu1 %vm103_vm5, %v15_v20  ;;  %406 = vmatprep.subr.mxu1 %v424_v10 }
 0x16e   :  { %408 = vmatprep.mubr.msk.f32.mxu1 %vm425_vm2, %v424_v10 }
 0x16f   :  { %v275_v21 = vpop.f32.mrb[2].mxu0 }
 0x170   :  { %v279_v22 = vmax.f32 %v275_v21, 0.0  ;;  %v405_v23 = vpop.f32.mrb[3].mxu0 }
 0x172   :  { %407 = vmatpush3.msk.msra.mxu1 %vm107_vm4, %v279_v22 }
 0x173   :  { %409 = vmatmul.mubr.msk.f32.vlgmr.msra.gmra.mrb[2].mxu1 %vm103_vm5, %v15_v20 }
 0x240   :  { %v177_v25 = vpop.f32.mrb[0].mxu1 }
 0x241   :  { %v400_v26 = vpop.f32.mrb[1].mxu1  ;;  %v377_v27 = vmul.f32 -1.442695, %v177_v25 }
 0x243   :  { %416 = vpow2.f32 %v377_v27 }
 0x246   :  { %v349_v28 = vpop.f32.mrb[2].mxu1 }
 0x247   :  { %v382_v29 = vmul.f32 -1.442695, %v349_v28  ;;  %v410_v30 = vpop.f32.mrb[3].mxu1 }
 0x249   :  { %418 = vpow2.f32 %v382_v29 }
 0x24d   :  { %v417_v31 = vpop.eup %416 }
 0x24e   :  { %v184_v34 = vadd.f32 1.0, %v417_v31 }
 0x253   :  { %v419_v32 = vpop.eup %418 }
 0x254   :  { %v356_v33 = vadd.f32 1.0, %v419_v32 }
 0x256   :  { %420 = vrcp.f32 %v356_v33 }
 0x257   :  { %422 = vrcp.f32 %v184_v34 }
 0x260   :  { %v421_v35 = vpop.eup %420 }
 0x261   :  { %361 = vperm.xlu1 %414, %v421_v35   ;;  %v423_v36 = vpop.eup %422 }
 0x265   :  { %189 = vperm.xlu1 %414, %v423_v36  }
 0x2e0   :  { %v362_v37 = vpop.permute.xlu1 %361 }
 0x2e1   :  { %v363_v38 = vrot.slane %v362_v37, 4 }
 0x2e3   :  { %v365_v39 = vmul.f32 %v363_v38, %v460_v2  ;;  %v366_v40 = vmul.f32 %v363_v38, %v469_v5 }
 0x2e4   :  { %v190_v41 = vpop.permute.xlu1 %189 }
 0x2e5   :  { %367 = vst [vmem:[%s504_s3] sm:$0xf0] %v365_v39  ;;  %368 = vst [vmem:[%s504_s3 + $0x8] sm:$0xf0] %v366_v40  ;;  %v192_v42 = vmul.f32 %v190_v41, %v450_v0  ;;  %v193_v43 = vmul.f32 %v190_v41, %v455_v1 }
 0x2e7   :  { %194 = vst [vmem:[%s504_s3] sm:$0xf] %v192_v42  ;;  %195 = vst [vmem:[%s504_s3 + $0x8] sm:$0xf] %v193_v43 }

</bundles_post_ra>
